<compile_context>
chip_gen: v7x
topology: tpu7x:2x2x1
jax: 0.10.0
libtpu: 0.0.40
codegen_flags: <defaults>
</compile_context>

<pallas_src>
import functools

import numpy as np
import jax
import jax.numpy as jnp
from jax.experimental import pallas as pl
from jax.experimental.pallas import tpu as pltpu


def _make_weights(lam=5.32e-07, n_pixels=8, pixel_size=2e-05, dz=0.01):
    """Deterministic reproduction of the module's __init__ (numpy, complex128)."""
    x = np.arange(n_pixels) * pixel_size
    y = np.arange(n_pixels) * pixel_size
    x_grid1, y_grid1, x_grid2, y_grid2 = np.meshgrid(x, y, x, y)
    r = np.sqrt((x_grid1 - x_grid2) ** 2 + (y_grid1 - y_grid2) ** 2 + dz ** 2)
    w = dz / r ** 2 * (1.0 / (2.0 * np.pi * r) + 1.0 / (1j * lam)) * np.exp(
        1j * 2.0 * np.pi * r / lam
    )
    return w  # complex128, shape (N, N, N, N)


def _tpu_memory_budget():
    """(vmem_limit_bytes, per-tile byte budget), sized per TPU generation."""
    try:
        cap = int(pltpu.get_tpu_info().vmem_capacity_bytes)
    except Exception:
        cap = 64 * 1024 * 1024  # conservative (v7x-sized) fallback
    vmem_limit = min((cap * 3) // 4, 96 * 1024 * 1024)   # 48 MiB v7x, 96 MiB v5e/v6e
    tile_budget = min(cap // 4, 32 * 1024 * 1024)        # 16 MiB v7x, 32 MiB v5e/v6e
    return vmem_limit, tile_budget


def pick_column_tile(bc, n, m_pad, budget_bytes):
    """Largest multiple-of-128 column tile TN dividing bc = N*N*N such that the
    double-buffered packed-W tile + double-buffered re/im output tiles + the
    resident stacked-E block fit in `budget_bytes`.  Small problems get a
    single full-extent block (zero per-step overhead)."""
    elt = 4  # float32
    e_bytes = 2 * m_pad * n * elt  # resident [E_re; E_im]

    def footprint(t):
        w_bytes = 2 * (n * 2 * t * elt)          # double-buffered (N, 2*TN) W slab
        out_bytes = 2 * 2 * (m_pad * t * elt)    # double-buffered re + im tiles
        return w_bytes + out_bytes + e_bytes

    # Small-problem early out / ragged fallback: one full-extent block.
    if footprint(bc) <= budget_bytes or bc % 128 != 0:
        return bc
    candidates = [t for t in range(128, bc + 1, 128)
                  if bc % t == 0 and footprint(t) <= budget_bytes]
    return max(candidates) if candidates else 128


def prepare_weights(w_complex, tile_n):
    """One-time (weight-build-time) re-layout of the (N,N,N,N) complex weights.

    Returns float32 array of shape (num_tiles, N, 2*TN): tile t holds the
    columns [t*TN, (t+1)*TN) of the flattened weight matrix
    W_flat[k, i*N*N + j*N + c] = W[i, j, k, c], packed as [W_re | W_im] along
    the last axis.  Each tile is a contiguous HBM slab (one dense DMA)."""
    n = w_complex.shape[-1]
    bc = w_complex.shape[0] * w_complex.shape[1] * n
    assert bc % tile_n == 0
    num_tiles = bc // tile_n
    w_flat = np.transpose(np.asarray(w_complex), (2, 0, 1, 3)).reshape(n, bc)
    wr = w_flat.real.reshape(n, num_tiles, tile_n)
    wi = w_flat.imag.reshape(n, num_tiles, tile_n)
    packed = np.concatenate([wr, wi], axis=-1)          # (N, T, 2*TN)
    packed = np.ascontiguousarray(np.transpose(packed, (1, 0, 2)))  # (T, N, 2*TN)
    return jnp.asarray(packed, dtype=jnp.float32)


def _fused_cmatmul_kernel(e_ref, w_ref, or_ref, oi_ref):
    """One column tile of the flattened complex matmul.

    e_ref : (2*M_pad, N)     stacked [E_re; E_im]          (resident)
    w_ref : (1, N, 2*TN)     packed [W_re tile | W_im tile] contiguous slab
    or/oi : (1, M_pad, TN)   real / imag output slab for this tile
    """
    m_pad = or_ref.shape[1]
    tn = or_ref.shape[2]
    # Single fused MXU matmul per tile (re/im recovered with 2 VPU add/subs).
    res = jnp.dot(
        e_ref[...], w_ref[0],
        preferred_element_type=jnp.float32,
        precision=jax.lax.Precision.HIGHEST,
    )
    rr = res[:m_pad, :tn]   # E_re @ W_re
    ri = res[:m_pad, tn:]   # E_re @ W_im
    ir = res[m_pad:, :tn]   # E_im @ W_re
    ii = res[m_pad:, tn:]   # E_im @ W_im
    or_ref[0] = rr - ii
    oi_ref[0] = ri + ir


@functools.partial(jax.jit, static_argnums=(3,))
def fraunhofer_forward(e_re, e_im, w_packed, tile_n):
    """e_re/e_im: (M, N); w_packed: (num_tiles, N, 2*TN) from prepare_weights.

    Returns complex64 output of shape (N, N, M, N) (same as torch.matmul)."""
    m, n = e_re.shape
    num_tiles, n_w, two_tn = w_packed.shape
    assert n_w == n and two_tn == 2 * tile_n
    bc = num_tiles * tile_n
    assert bc == n * n * n

    # Pad M to the f32 sublane count so in-kernel row slices / stores are
    # unmasked and vreg-aligned; padding is trimmed below inside this jit.
    m_pad = ((m + 7) // 8) * 8
    if m_pad != m:
        zeros = jnp.zeros((m_pad - m, n), e_re.dtype)
        e_re_p = jnp.concatenate([e_re, zeros], axis=0)
        e_im_p = jnp.concatenate([e_im, zeros], axis=0)
    else:
        e_re_p, e_im_p = e_re, e_im
    e_stacked = jnp.concatenate([e_re_p, e_im_p], axis=0)   # (2*M_pad, N)

    vmem_limit, _ = _tpu_memory_budget()

    out_re, out_im = pl.pallas_call(
        _fused_cmatmul_kernel,
        out_shape=(
            jax.ShapeDtypeStruct((num_tiles, m_pad, tile_n), jnp.float32),
            jax.ShapeDtypeStruct((num_tiles, m_pad, tile_n), jnp.float32),
        ),
        grid_spec=pltpu.PrefetchScalarGridSpec(
            num_scalar_prefetch=0,
            grid=(num_tiles,),
            in_specs=[
                pl.BlockSpec((2 * m_pad, n), lambda t: (0, 0)),        # E (resident)
                pl.BlockSpec((1, n, 2 * tile_n), lambda t: (t, 0, 0)),  # W slab t
            ],
            out_specs=[
                pl.BlockSpec((1, m_pad, tile_n), lambda t: (t, 0, 0)),  # out real
                pl.BlockSpec((1, m_pad, tile_n), lambda t: (t, 0, 0)),  # out imag
            ],
        ),
        compiler_params=pltpu.CompilerParams(
            dimension_semantics=("parallel",),
            vmem_limit_bytes=vmem_limit,
        ),
    )(e_stacked, w_packed)

    # Trim M padding, undo the column tiling, and combine re/im -- all inside
    # this jit so XLA fuses it (no standalone full-array HBM pass).
    def untile(o):
        o = o[:, :m, :]                                   # (T, M, TN)
        o = jnp.transpose(o, (1, 0, 2)).reshape(m, n, n, n)
        return jnp.transpose(o, (1, 2, 0, 3))             # (N, N, M, N)

    return jax.lax.complex(untile(out_re), untile(out_im))


if __name__ == "__main__":
    N_PIXELS = 8   # small spatial grid (module default is 400)
    M_ROWS = 4     # rows of the input field E

    # Deterministic weights from the module's geometry formula.
    w = _make_weights(n_pixels=N_PIXELS)
    w_re = jnp.asarray(w.real, dtype=jnp.float32)
    w_im = jnp.asarray(w.imag, dtype=jnp.float32)

    # One-time weight re-layout (equivalent to the module's __init__).
    bc = N_PIXELS ** 3
    m_pad = ((M_ROWS + 7) // 8) * 8
    _, tile_budget = _tpu_memory_budget()
    tile_n = pick_column_tile(bc, N_PIXELS, m_pad, tile_budget)
    w_packed = prepare_weights(w, tile_n)

    # Deterministic complex input field E of shape (M, N).
    key = jax.random.PRNGKey(0)
    k1, k2 = jax.random.split(key)
    e_re = jax.random.normal(k1, (M_ROWS, N_PIXELS), dtype=jnp.float32)
    e_im = jax.random.normal(k2, (M_ROWS, N_PIXELS), dtype=jnp.float32)

    out = fraunhofer_forward(e_re, e_im, w_packed, tile_n)
    out = jax.block_until_ready(out)

    # Reference: plain-JAX complex matmul broadcasting, same semantics as
    # torch.matmul(E, weights), at matching f32 precision.
    e_c = jax.lax.complex(e_re, e_im)
    w_c = jax.lax.complex(w_re, w_im)
    ref = jnp.matmul(e_c, w_c)
    np.testing.assert_allclose(np.asarray(out), np.asarray(ref), rtol=2e-3, atol=1e-2)

    # Also exercise the multi-tile path (grid > 1) with the same inputs by
    # forcing a small column tile; silently checked against the same reference.
    tile_n_small = 128
    w_packed_small = prepare_weights(w, tile_n_small)
    out_tiled = jax.block_until_ready(
        fraunhofer_forward(e_re, e_im, w_packed_small, tile_n_small))
    np.testing.assert_allclose(np.asarray(out_tiled), np.asarray(ref),
                               rtol=2e-3, atol=1e-2)

    print("KERNEL_OK")
</pallas_src>

<mosaic_0001>
module attributes {stable_mosaic.version = 11 : i64} {
  func.func @_fused_cmatmul_kernel(%arg0: i32, %arg1: memref<16x8xf32, #tpu.memory_space<vmem>>, %arg2: memref<1x8x1024xf32, #tpu.memory_space<vmem>>, %arg3: memref<1x8x512xf32, #tpu.memory_space<vmem>>, %arg4: memref<1x8x512xf32, #tpu.memory_space<vmem>>) attributes {dimension_semantics = [#tpu.dimension_semantics<parallel>], iteration_bounds = array<i64: 1>, scalar_prefetch = 0 : i64, scratch_operands = 0 : i64, tpu.core_type = #tpu.core_type<tc>, window_params = [{pipeline_mode = #tpu.pipeline_mode<synchronous>, transform_indices = @transform_0, window_bounds = array<i64: 16, 8>}, {transform_indices = @transform_1, window_bounds = array<i64: 1, 8, 1024>}, {transform_indices = @transform_2, window_bounds = array<i64: 1, 8, 512>}, {transform_indices = @transform_3, window_bounds = array<i64: 1, 8, 512>}]} {
    %c0 = arith.constant 0 : index
    %c0_0 = arith.constant 0 : index
    %0 = vector.load %arg1[%c0, %c0_0] : memref<16x8xf32, #tpu.memory_space<vmem>>, vector<16x8xf32>
    %c0_1 = arith.constant 0 : index
    %c0_2 = arith.constant 0 : index
    %c0_3 = arith.constant 0 : index
    %1 = vector.load %arg2[%c0_1, %c0_2, %c0_3] : memref<1x8x1024xf32, #tpu.memory_space<vmem>>, vector<1x8x1024xf32>
    %2 = vector.shape_cast %1 : vector<1x8x1024xf32> to vector<8x1024xf32>
    %cst = arith.constant dense<0.000000e+00> : vector<16x1024xf32>
    %3 = tpu.matmul %0, %2, %cst {dimension_numbers = #tpu.dot_dimension_numbers<[1], [0], [0], [1], [0, 0, 1, 1], [], []>, precision = #tpu.contract_precision<fp32>} : vector<16x8xf32>, vector<8x1024xf32>, vector<16x1024xf32> -> vector<16x1024xf32>
    %4 = vector.extract_strided_slice %3 {offsets = [0, 0], sizes = [8, 512], strides = [1, 1]} : vector<16x1024xf32> to vector<8x512xf32>
    %5 = vector.extract_strided_slice %3 {offsets = [0, 512], sizes = [8, 512], strides = [1, 1]} : vector<16x1024xf32> to vector<8x512xf32>
    %6 = vector.extract_strided_slice %3 {offsets = [8, 0], sizes = [8, 512], strides = [1, 1]} : vector<16x1024xf32> to vector<8x512xf32>
    %7 = vector.extract_strided_slice %3 {offsets = [8, 512], sizes = [8, 512], strides = [1, 1]} : vector<16x1024xf32> to vector<8x512xf32>
    %8 = arith.subf %4, %7 : vector<8x512xf32>
    %c0_4 = arith.constant 0 : index
    %c0_5 = arith.constant 0 : index
    %c0_6 = arith.constant 0 : index
    %9 = vector.load %arg3[%c0_4, %c0_5, %c0_6] : memref<1x8x512xf32, #tpu.memory_space<vmem>>, vector<1x8x512xf32>
    %10 = vector.shape_cast %9 : vector<1x8x512xf32> to vector<8x512xf32>
    %11 = vector.shape_cast %8 : vector<8x512xf32> to vector<1x8x512xf32>
    tpu.vector_store %arg3[%c0_4, %c0_5, %c0_6], %11 {strides = array<i32>} : memref<1x8x512xf32, #tpu.memory_space<vmem>>, vector<1x8x512xf32>,
    %12 = arith.addf %5, %6 : vector<8x512xf32>
    %c0_7 = arith.constant 0 : index
    %c0_8 = arith.constant 0 : index
    %c0_9 = arith.constant 0 : index
    %13 = vector.load %arg4[%c0_7, %c0_8, %c0_9] : memref<1x8x512xf32, #tpu.memory_space<vmem>>, vector<1x8x512xf32>
    %14 = vector.shape_cast %13 : vector<1x8x512xf32> to vector<8x512xf32>
    %15 = vector.shape_cast %12 : vector<8x512xf32> to vector<1x8x512xf32>
    tpu.vector_store %arg4[%c0_7, %c0_8, %c0_9], %15 {strides = array<i32>} : memref<1x8x512xf32, #tpu.memory_space<vmem>>, vector<1x8x512xf32>,
    return
  }
  func.func @transform_0(%arg0: i32) -> (i32, i32) {
    %c0_i32 = arith.constant 0 : i32
    %c0_i32_0 = arith.constant 0 : i32
    %c0_i32_1 = arith.constant 0 : i32
    return %c0_i32, %c0_i32_0 : i32, i32
  }
  func.func @transform_1(%arg0: i32) -> (i32, i32, i32) {
    %c0_i32 = arith.constant 0 : i32
    %c0_i32_0 = arith.constant 0 : i32
    %c0_i32_1 = arith.constant 0 : i32
    return %arg0, %c0_i32, %c0_i32_0 : i32, i32, i32
  }
  func.func @transform_2(%arg0: i32) -> (i32, i32, i32) {
    %c0_i32 = arith.constant 0 : i32
    %c0_i32_0 = arith.constant 0 : i32
    %c0_i32_1 = arith.constant 0 : i32
    return %arg0, %c0_i32, %c0_i32_0 : i32, i32, i32
  }
  func.func @transform_3(%arg0: i32) -> (i32, i32, i32) {
    %c0_i32 = arith.constant 0 : i32
    %c0_i32_0 = arith.constant 0 : i32
    %c0_i32_1 = arith.constant 0 : i32
    return %arg0, %c0_i32, %c0_i32_0 : i32, i32, i32
  }
}

</mosaic_0001>

<bundles_post_ra>
// kernel: custom-call
= control target key start
LH: loop header
LB: loop body
LE: loop exit
PB: predicated region body
PF: predicated region fallthrough
CT: control target
= control target key end

     0   :  { %s126_s0 = inlined_call_operand.vmem [shape: f32[8,8,4,8], index: 0, kind: input, shape index: {}]   ;;  %s127_s1 = inlined_call_operand.vmem [shape: f32[8,8,4,8], index: 1, kind: input, shape index: {}]   ;;  %s128_s2 = inlined_call_operand.hbm [shape: c64[8,8,4,8], index: 2, kind: output, shape index: {}]  }
   0x1   :  { %s87_s11 = scalar_lea.hbm %s128_s2, 4096 }
   0x2   :  { %4 = vsyncpa [#allocation0], 0  ;;  %s5_s14 = sshll.u32 %s126_s0, 4  ;;  %s6_s14 = int_to_ptr.vmem [resolvable:$true] %s5_s14 }
   0x3   :  { %s18_s15 = scalar_lea.vmem %s6_s14, 4096  ;;  %p23_p1 = scmp.lt.s32.totalorder %s6_s14, %s6_s14 }
   0x4   :  { %p19_p0 = scmp.ne.s32.totalorder %s6_s14, %s18_s15  ;;  %p24_p2 = scmp.lt.s32.totalorder %s18_s15, %s18_s15 }
   0x6   :  { %p25_p3 = por %p24_p2, %p23_p1 }
   0x8   :  { %p26_p4 = pnand %p25_p3, %p19_p0 }
   0xa   :  { %29 = shalt.err (!%p26_p4)  }
   0xb   :  { %p31_p5 = scmp.ne.s32.totalorder %s128_s2, %s87_s11  ;;  %s32_s0 = scalar_lea.hbm %s128_s2, 8192 }
   0xc   :  { %p33_p6 = scmp.lt.u32.totalorder %s32_s0, %s87_s11  ;;  %p34_p7 = scmp.lt.u32.totalorder %s87_s11, %s128_s2 }
   0xe   :  { %p35_p8 = por %p34_p7, %p33_p6 }
  0x10   :  { %p36_p9 = pnand %p35_p8, %p31_p5 }
  0x12   :  { %39 = shalt.err (!%p36_p9)  }
  0x13   :  { %8 = dma.vmem_to_hbm [thread:$0]  %s6_s14, 4096, %s128_s2, [#allocation0] }
  0x14   :  { %65 = dma.done.wait [#allocation0], 4096  }
  0x15   :  { %66 = vsyncadd [#allocation0], 4294963200 }
  0x16   :  { %10 = vsyncpa [#allocation0], 1 }
  0x17   :  { %11 = vsyncpa [#allocation1], 0  ;;  %s12_s28 = sshll.u32 %s127_s1, 4  ;;  %s13_s28 = int_to_ptr.vmem [resolvable:$true] %s12_s28 }
  0x18   :  { %s40_s29 = scalar_lea.vmem %s13_s28, 4096  ;;  %p45_p11 = scmp.lt.s32.totalorder %s13_s28, %s13_s28 }
  0x19   :  { %p41_p10 = scmp.ne.s32.totalorder %s13_s28, %s40_s29  ;;  %p46_p12 = scmp.lt.s32.totalorder %s40_s29, %s40_s29 }
  0x1b   :  { %p47_p13 = por %p46_p12, %p45_p11 }
  0x1d   :  { %p48_p0 = pnand %p47_p13, %p41_p10 }
  0x1f   :  { %51 = shalt.err (!%p48_p0)  }
  0x20   :  { %p53_p1 = scmp.ne.s32.totalorder %s87_s11, %s32_s0  ;;  %p56_p2 = scmp.lt.u32.totalorder %s32_s0, %s32_s0 }
  0x22   :  { %p57_p3 = por %p56_p2, %p34_p7 }
  0x24   :  { %p59_p4 = por %p57_p3, %p33_p6 }
  0x26   :  { %p60_p5 = pnand %p59_p4, %p53_p1 }
  0x28   :  { %63 = shalt.err (!%p60_p5)  }
  0x29   :  { %15 = dma.vmem_to_hbm [thread:$0]  %s13_s28, 4096, %s87_s11, [#allocation1] }
  0x2a   :  { %67 = dma.done.wait [#allocation1], 4096  }
  0x2b   :  { %68 = vsyncadd [#allocation1], 4294963200 }
  0x2c   :  { %17 = vsyncpa [#allocation1], 1 }

// kernel: fraunhofer_forward.1
= control target key start
LH: loop header
LB: loop body
LE: loop exit
PB: predicated region body
PF: predicated region fallthrough
CT: control target
= control target key end

     0   :  { %9 = vsyncpa [#allocation3], 0  ;;  %s2233_s12 = smov [#allocation2]   ;;  %s2493_s0 = inlined_call_operand.vmem [shape: f32[16,8], index: 0, kind: input, shape index: {}]   ;;  %s2494_s1 = inlined_call_operand.hbm [shape: f32[1,8,1024], index: 1, kind: input, shape index: {}]   ;;  %s2495_s2 = inlined_call_operand.vmem [shape: f32[1,8,512], index: 2, kind: output, shape index: {0}]   ;;  %s2496_s3 = inlined_call_operand.vmem [shape: f32[1,8,512], index: 3, kind: output, shape index: {1}]  }
   0x1   :  { %s18_s13 = sshll.u32 %s2233_s12, 4  ;;  %s2209_s16 = scalar_lea.hbm %s2494_s1, 1024  ;;  %s19_s13 = int_to_ptr.vmem [resolvable:$true] %s18_s13 }
   0x2   :  { %p2210_p0 = scmp.ne.s32.totalorder %s2494_s1, %s2209_s16  ;;  %p2213_p1 = scmp.lt.u32.totalorder %s2209_s16, %s2494_s1 }
   0x4   :  { %p2215_p2 = pnand %p2213_p1, %p2210_p0 }
   0x6   :  { %2218 = shalt.err (!%p2215_p2)
}
   0x7   :  { %s2219_s21 = scalar_lea.vmem %s19_s13, 1024  ;;  %p2224_p4 = scmp.lt.s32.totalorder %s19_s13, %s19_s13 }
   0x8   :  { %p2220_p3 = scmp.ne.s32.totalorder %s19_s13, %s2219_s21  ;;  %p2225_p5 = scmp.lt.s32.totalorder %s2219_s21, %s2219_s21 }
   0xa   :  { %p2226_p6 = por %p2225_p5, %p2224_p4 }
   0xc   :  { %p2227_p7 = pnand %p2226_p6, %p2220_p3 }
   0xe   :  { %2230 = shalt.err (!%p2227_p7)
}
   0xf   :  { %21 = dma.hbm_to_vmem [thread:$0]  %s2494_s1, 1024, %s19_s13, [#allocation3]  }
  0x10   :  { %2231 = dma.done.wait [#allocation3], 1024  }
  0x11   :  { %2232 = vsyncadd [#allocation3], 4294966272  ;;  %v2234_v0 = vmov 0.0   ;;  %vm35_vm0 = vcmask 64512   ;;  %v28_v1 = vld [vmem:[#allocation2 + $0x8] sm:$0xff]  ;;  %v30_v2 = vld [vmem:[#allocation2 + $0x18] sm:$0xff] }
  0x12   :  { %108 = vmatprep.mubr.f32.mxu0 %v2234_v0  ;;  %622 = vmatprep.mubr.f32.mxu1 %v2234_v0  ;;  %v27_v3 = vld [vmem:[#allocation2] sm:$0xff]  ;;  %v2269_v4 = vand.u32 4294901760, %v28_v1  ;;  %v2271_v5 = vand.u32 4294901760, %v30_v2  ;;  %v29_v7 = vld [vmem:[#allocation2 + $0x10] sm:$0xff]  ;;  %v26_v9 = vld [vmem:[%s2493_s0 + $0x8] sm:$0xff] }
  0x13   :  { %v2273_v6 = vand.u32 4294901760, %v27_v3  ;;  %v25_v8 = vld [vmem:[%s2493_s0] sm:$0xff]  ;;  %v2281_v10 = vand.u32 4294901760, %v29_v7  ;;  %v40_v12 = vsel %vm35_vm0, %v26_v9, 0  ;;  %v32_v39 = vld [vmem:[#allocation2 + $0x28] sm:$0xff]  ;;  %v34_v40 = vld [vmem:[#allocation2 + $0x38] sm:$0xff] }
  0x14   :  { %v37_v11 = vsel %vm35_vm0, %v25_v8, 0  ;;  %43 = vmatprep.subr.mxu0 %v2269_v4  ;;  %557 = vmatprep.subr.mxu1 %v2271_v5  ;;  %v132_v14 = vsub.f32 %v28_v1, %v2269_v4  ;;  %v646_v15 = vsub.f32 %v30_v2, %v2271_v5  ;;  %v2297_v18 = vand.u32 4294901760, %v40_v12  ;;  %v31_v45 = vld [vmem:[#allocation2 + $0x20] sm:$0xff]  ;;  %v33_v46 = vld [vmem:[#allocation2 + $0x30] sm:$0xff] }
  0x15   :  { %v2286_v13 = vsub.f32 %v27_v3, %v2273_v6  ;;  %v2290_v16 = vand.u32 4294901760, %v37_v11  ;;  %45 = vmatpush1.msra.mxu0 %v2273_v6  ;;  %559 = vmatpush1.msra.mxu1 %v2281_v10  ;;  %v2295_v17 = vsub.f32 %v29_v7, %v2281_v10  ;;  %v2353_v41 = vand.u32 4294901760, %v32_v39 }
  0x16   :  { %v133_v19 = vand.u32 4294901760, %v132_v14  ;;  %v647_v20 = vand.u32 4294901760, %v646_v15  ;;  %v2305_v24 = vsub.f32 %v40_v12, %v2297_v18  ;;  %v2355_v42 = vand.u32 4294901760, %v34_v40 }
  0x17   :  { %v2300_v21 = vsub.f32 %v37_v11, %v2290_v16  ;;  %v139_v22 = vand.u32 4294901760, %v2286_v13  ;;  %v653_v23 = vand.u32 4294901760, %v2295_v17  ;;  %v2364_v43 = vsub.f32 %v32_v39, %v2353_v41 }
  0x18   :  { %v134_v25 = vsub.f32 %v132_v14, %v133_v19  ;;  %v648_v26 = vsub.f32 %v646_v15, %v647_v20  ;;  %v2313_v30 = vand.u32 4294901760, %v2305_v24  ;;  %v2367_v44 = vsub.f32 %v34_v40, %v2355_v42 }
  0x19   :  { %v2308_v27 = vand.u32 4294901760, %v2300_v21  ;;  %v140_v28 = vsub.f32 %v2286_v13, %v139_v22  ;;  %v654_v29 = vsub.f32 %v2295_v17, %v653_v23  ;;  %v1161_v47 = vand.u32 4294901760, %v2364_v43 }
  0x1a   :  { %v135_v31 = vand.u32 4294901760, %v134_v25  ;;  %v649_v32 = vand.u32 4294901760, %v648_v26  ;;  %v123_v36 = vsub.f32 %v2305_v24, %v2313_v30  ;;  %v1675_v48 = vand.u32 4294901760, %v2367_v44 }
  0x1b   :  { %v112_v33 = vsub.f32 %v2300_v21, %v2308_v27  ;;  %v141_v34 = vand.u32 4294901760, %v140_v28  ;;  %v655_v35 = vand.u32 4294901760, %v654_v29  ;;  %v2379_v49 = vand.u32 4294901760, %v31_v45 }
  0x1c   :  { %136 = vmatprep.subr.mxu0 %v135_v31  ;;  %650 = vmatprep.subr.mxu1 %v649_v32  ;;  %v2323_v38 = vand.u32 4294901760, %v123_v36  ;;  %v2381_v50 = vand.u32 4294901760, %v33_v46  ;;  %v1162_v51 = vsub.f32 %v2364_v43, %v1161_v47  ;;  %v1676_v52 = vsub.f32 %v2367_v44, %v1675_v48 }
  0x1d   :  { %v2319_v37 = vand.u32 4294901760, %v112_v33  ;;  %v1166_v53 = vsub.f32 %v31_v45, %v2379_v49 }
  0x1e   :  { %v1680_v54 = vsub.f32 %v33_v46, %v2381_v50  ;;  %v1163_v55 = vand.u32 4294901760, %v1162_v51  ;;  %v1677_v56 = vand.u32 4294901760, %v1676_v52 }
  0x1f   :  { %114 = vmatmul.mubr.f32.vlgmr.msra.gmra.mrb[0].mxu0 %v2319_v37  ;;  %628 = vmatmul.mubr.f32.vlgmr.msra.gmra.mrb[0].mxu1 %v2319_v37  ;;  %v1167_v57 = vand.u32 4294901760, %v1166_v53 }
  0x20   :  { %142 = vmatpush1.msra.mxu0 %v141_v34  ;;  %656 = vmatpush1.msra.mxu1 %v655_v35  ;;  %v1681_v58 = vand.u32 4294901760, %v1680_v54 }
  0x21   :  { %119 = vmatprep.mubr.f32.mxu0 %v2234_v0  ;;  %633 = vmatprep.mubr.f32.mxu1 %v2234_v0  ;;  %v1168_v59 = vsub.f32 %v1166_v53, %v1167_v57 }
  0x22   :  { %222 = vmatprep.subr.mxu0 %v132_v14  ;;  %736 = vmatprep.subr.mxu1 %v646_v15  ;;  %v1682_v60 = vsub.f32 %v1680_v54, %v1681_v58 }
  0x23   :  { %125 = vmatmul.mubr.f32.gmra.mrb[2].mxu0 %v2323_v38  ;;  %639 = vmatmul.mubr.f32.gmra.mrb[2].mxu1 %v2323_v38  ;;  %v1169_v61 = vand.u32 4294901760, %v1168_v59 }
  0x24   :  { %205 = vmatprep.mubr.f32.mxu0 %v2234_v0  ;;  %719 = vmatprep.mubr.f32.mxu1 %v2234_v0  ;;  %v1683_v62 = vand.u32 4294901760, %v1682_v60 }
  0x27   :  { %207 = vmatmul.mubr.f32.vlgmr.msra.gmra.mrb[0].mxu0 %v2290_v16  ;;  %721 = vmatmul.mubr.f32.vlgmr.msra.gmra.mrb[0].mxu1 %v2290_v16 }
  0x28   :  { %225 = vmatpush1.msra.mxu0 %v2286_v13  ;;  %739 = vmatpush1.msra.mxu1 %v2295_v17 }
  0x29   :  { %212 = vmatprep.mubr.f32.mxu0 %v2234_v0  ;;  %726 = vmatprep.mubr.f32.mxu1 %v2234_v0 }
  0x2a   :  { %306 = vmatprep.subr.mxu0 %v2269_v4  ;;  %820 = vmatprep.subr.mxu1 %v2271_v5 }
  0x2b   :  { %214 = vmatmul.mubr.f32.gmra.mrb[2].mxu0 %v2297_v18  ;;  %728 = vmatmul.mubr.f32.gmra.mrb[2].mxu1 %v2297_v18 }
  0x2c   :  { %288 = vmatprep.mubr.f32.mxu0 %v2234_v0  ;;  %802 = vmatprep.mubr.f32.mxu1 %v2234_v0 }
  0x2f   :  { %291 = vmatmul.mubr.f32.vlgmr.msra.gmra.mrb[0].mxu0 %v2300_v21  ;;  %805 = vmatmul.mubr.f32.vlgmr.msra.gmra.mrb[0].mxu1 %v2300_v21 }
  0x30   :  { %308 = vmatpush1.msra.mxu0 %v2273_v6  ;;  %822 = vmatpush1.msra.mxu1 %v2281_v10 }
  0x31   :  { %296 = vmatprep.mubr.f32.mxu0 %v2234_v0  ;;  %810 = vmatprep.mubr.f32.mxu1 %v2234_v0 }
  0x32   :  { %393 = vmatprep.subr.mxu0 %v133_v19  ;;  %907 = vmatprep.subr.mxu1 %v647_v20 }
  0x33   :  { %299 = vmatmul.mubr.f32.gmra.mrb[2].mxu0 %v2305_v24  ;;  %813 = vmatmul.mubr.f32.gmra.mrb[2].mxu1 %v2305_v24 }
  0x34   :  { %371 = vmatprep.mubr.f32.mxu0 %v2234_v0  ;;  %885 = vmatprep.mubr.f32.mxu1 %v2234_v0 }
  0x37   :  { %375 = vmatmul.mubr.f32.vlgmr.msra.gmra.mrb[0].mxu0 %v2308_v27  ;;  %889 = vmatmul.mubr.f32.vlgmr.msra.gmra.mrb[0].mxu1 %v2308_v27 }
  0x38   :  { %397 = vmatpush1.msra.mxu0 %v139_v22  ;;  %911 = vmatpush1.msra.mxu1 %v653_v23 }
  0x39   :  { %380 = vmatprep.mubr.f32.mxu0 %v2234_v0  ;;  %894 = vmatprep.mubr.f32.mxu1 %v2234_v0 }
  0x3a   :  { %476 = vmatprep.subr.mxu0 %v2269_v4  ;;  %990 = vmatprep.subr.mxu1 %v2271_v5 }
  0x3b   :  { %384 = vmatmul.mubr.f32.gmra.mrb[2].mxu0 %v2313_v30  ;;  %898 = vmatmul.mubr.f32.gmra.mrb[2].mxu1 %v2313_v30 }
  0x3c   :  { %460 = vmatprep.mubr.f32.mxu0 %v2234_v0  ;;  %974 = vmatprep.mubr.f32.mxu1 %v2234_v0 }
  0x3f   :  { %462 = vmatmul.mubr.f32.vlgmr.msra.gmra.mrb[0].mxu0 %v2290_v16  ;;  %976 = vmatmul.mubr.f32.vlgmr.msra.gmra.mrb[0].mxu1 %v2290_v16 }
  0x40   :  { %478 = vmatpush1.msra.mxu0 %v2273_v6  ;;  %992 = vmatpush1.msra.mxu1 %v2281_v10 }
  0x41   :  { %467 = vmatprep.mubr.f32.mxu0 %v2234_v0  ;;  %981 = vmatprep.mubr.f32.mxu1 %v2234_v0 }
  0x42   :  { %1071 = vmatprep.subr.mxu0 %v2353_v41  ;;  %1585 = vmatprep.subr.mxu1 %v2355_v42 }
  0x43   :  { %469 = vmatmul.mubr.f32.gmra.mrb[2].mxu0 %v2297_v18  ;;  %983 = vmatmul.mubr.f32.gmra.mrb[2].mxu1 %v2297_v18 }
  0x44   :  { %541 = vmatprep.mubr.f32.mxu0 %v2234_v0  ;;  %1055 = vmatprep.mubr.f32.mxu1 %v2234_v0 }
  0x47   :  { %543 = vmatmul.mubr.f32.vlgmr.msra.gmra.mrb[0].mxu0 %v2290_v16  ;;  %1057 = vmatmul.mubr.f32.vlgmr.msra.gmra.mrb[0].mxu1 %v2290_v16 }
  0x48   :  { %1073 = vmatpush1.msra.mxu0 %v2379_v49  ;;  %1587 = vmatpush1.msra.mxu1 %v2381_v50 }
  0x49   :  { %548 = vmatprep.mubr.f32.mxu0 %v2234_v0  ;;  %1062 = vmatprep.mubr.f32.mxu1 %v2234_v0 }
  0x4a   :  { %1164 = vmatprep.subr.mxu0 %v1163_v55  ;;  %1678 = vmatprep.subr.mxu1 %v1677_v56 }
  0x4b   :  { %550 = vmatmul.mubr.f32.gmra.mrb[2].mxu0 %v2297_v18  ;;  %1064 = vmatmul.mubr.f32.gmra.mrb[2].mxu1 %v2297_v18 }
  0x4c   :  { %1136 = vmatprep.mubr.f32.mxu0 %v2234_v0  ;;  %1650 = vmatprep.mubr.f32.mxu1 %v2234_v0 }
  0x53   :  { %1142 = vmatmul.mubr.f32.vlgmr.msra.gmra.mrb[2].mxu0 %v2319_v37  ;;  %1656 = vmatmul.mubr.f32.vlgmr.msra.gmra.mrb[2].mxu1 %v2319_v37 }
  0x54   :  { %1170 = vmatpush1.msra.mxu0 %v1169_v61  ;;  %1684 = vmatpush1.msra.mxu1 %v1683_v62 }
  0x55   :  { %1147 = vmatprep.mubr.f32.mxu0 %v2234_v0  ;;  %1661 = vmatprep.mubr.f32.mxu1 %v2234_v0 }
  0x56   :  { %1250 = vmatprep.subr.mxu0 %v2364_v43  ;;  %1764 = vmatprep.subr.mxu1 %v2367_v44 }
  0x57   :  { %1153 = vmatmul.mubr.f32.gmra.mrb[4].mxu0 %v2323_v38  ;;  %1667 = vmatmul.mubr.f32.gmra.mrb[4].mxu1 %v2323_v38 }
  0x58   :  { %1233 = vmatprep.mubr.f32.mxu0 %v2234_v0  ;;  %1747 = vmatprep.mubr.f32.mxu1 %v2234_v0 }
  0x5b   :  { %1235 = vmatmul.mubr.f32.vlgmr.msra.gmra.mrb[2].mxu0 %v2290_v16  ;;  %1749 = vmatmul.mubr.f32.vlgmr.msra.gmra.mrb[2].mxu1 %v2290_v16 }
  0x5c   :  { %1253 = vmatpush1.msra.mxu0 %v1166_v53  ;;  %1767 = vmatpush1.msra.mxu1 %v1680_v54 }
  0x5d   :  { %1240 = vmatprep.mubr.f32.mxu0 %v2234_v0  ;;  %1754 = vmatprep.mubr.f32.mxu1 %v2234_v0 }
  0x5e   :  { %1334 = vmatprep.subr.mxu0 %v2353_v41  ;;  %1848 = vmatprep.subr.mxu1 %v2355_v42 }
  0x5f   :  { %1242 = vmatmul.mubr.f32.gmra.mrb[4].mxu0 %v2297_v18  ;;  %1756 = vmatmul.mubr.f32.gmra.mrb[4].mxu1 %v2297_v18 }
  0x60   :  { %1316 = vmatprep.mubr.f32.mxu0 %v2234_v0  ;;  %1830 = vmatprep.mubr.f32.mxu1 %v2234_v0 }
  0x63   :  { %1319 = vmatmul.mubr.f32.vlgmr.msra.gmra.mrb[2].mxu0 %v2300_v21  ;;  %1833 = vmatmul.mubr.f32.vlgmr.msra.gmra.mrb[2].mxu1 %v2300_v21 }
  0x64   :  { %1336 = vmatpush1.msra.mxu0 %v2379_v49  ;;  %1850 = vmatpush1.msra.mxu1 %v2381_v50 }
  0x65   :  { %1324 = vmatprep.mubr.f32.mxu0 %v2234_v0  ;;  %1838 = vmatprep.mubr.f32.mxu1 %v2234_v0 }
  0x66   :  { %1421 = vmatprep.subr.mxu0 %v1161_v47  ;;  %1935 = vmatprep.subr.mxu1 %v1675_v48 }
  0x67   :  { %1327 = vmatmul.mubr.f32.gmra.mrb[4].mxu0 %v2305_v24  ;;  %1841 = vmatmul.mubr.f32.gmra.mrb[4].mxu1 %v2305_v24 }
  0x68   :  { %1399 = vmatprep.mubr.f32.mxu0 %v2234_v0  ;;  %1913 = vmatprep.mubr.f32.mxu1 %v2234_v0 }
  0x6b   :  { %1403 = vmatmul.mubr.f32.vlgmr.msra.gmra.mrb[2].mxu0 %v2308_v27  ;;  %1917 = vmatmul.mubr.f32.vlgmr.msra.gmra.mrb[2].mxu1 %v2308_v27 }
  0x6c   :  { %1425 = vmatpush1.msra.mxu0 %v1167_v57  ;;  %1939 = vmatpush1.msra.mxu1 %v1681_v58 }
  0x6d   :  { %1408 = vmatprep.mubr.f32.mxu0 %v2234_v0  ;;  %1922 = vmatprep.mubr.f32.mxu1 %v2234_v0 }
  0x6e   :  { %1504 = vmatprep.subr.mxu0 %v2353_v41  ;;  %2018 = vmatprep.subr.mxu1 %v2355_v42 }
  0x6f   :  { %1412 = vmatmul.mubr.f32.gmra.mrb[4].mxu0 %v2313_v30  ;;  %1926 = vmatmul.mubr.f32.gmra.mrb[4].mxu1 %v2313_v30 }
  0x70   :  { %1488 = vmatprep.mubr.f32.mxu0 %v2234_v0  ;;  %2002 = vmatprep.mubr.f32.mxu1 %v2234_v0 }
  0x73   :  { %1490 = vmatmul.mubr.f32.vlgmr.msra.gmra.mrb[2].mxu0 %v2290_v16  ;;  %2004 = vmatmul.mubr.f32.vlgmr.msra.gmra.mrb[2].mxu1 %v2290_v16 }
  0x74   :  { %1506 = vmatpush1.msra.mxu0 %v2379_v49  ;;  %2020 = vmatpush1.msra.mxu1 %v2381_v50 }
  0x75   :  { %1495 = vmatprep.mubr.f32.mxu0 %v2234_v0  ;;  %2009 = vmatprep.mubr.f32.mxu1 %v2234_v0 }
  0x77   :  { %1497 = vmatmul.mubr.f32.gmra.mrb[4].mxu0 %v2297_v18  ;;  %2011 = vmatmul.mubr.f32.gmra.mrb[4].mxu1 %v2297_v18 }
  0x78   :  { %1569 = vmatprep.mubr.f32.mxu0 %v2234_v0  ;;  %2083 = vmatprep.mubr.f32.mxu1 %v2234_v0 }
  0x7b   :  { %1571 = vmatmul.mubr.f32.vlgmr.msra.gmra.mrb[2].mxu0 %v2290_v16  ;;  %2085 = vmatmul.mubr.f32.vlgmr.msra.gmra.mrb[2].mxu1 %v2290_v16 }
  0x7c   :  { %1576 = vmatprep.mubr.f32.mxu0 %v2234_v0  ;;  %2090 = vmatprep.mubr.f32.mxu1 %v2234_v0 }
  0x7f   :  { %1578 = vmatmul.mubr.f32.gmra.mrb[4].mxu0 %v2297_v18  ;;  %2092 = vmatmul.mubr.f32.gmra.mrb[4].mxu1 %v2297_v18 }
 0x11a   :  { %v544_v63 = vpop.f32.mrb[0].mxu0  ;;  %v1058_v1 = vpop.f32.mrb[0].mxu1 }
 0x11b   :  { %v546_v2 = vpop.f32.mrb[1].mxu0  ;;  %v1060_v3 = vpop.f32.mrb[1].mxu1 }
 0x14e   :  { %v1572_v4 = vpop.f32.mrb[2].mxu0  ;;  %v2086_v5 = vpop.f32.mrb[2].mxu1 }
 0x14f   :  { %2110 = vst [vmem:[%s2496_s3] sm:$0xff] %v1572_v4  ;;  %2112 = vst [vmem:[%s2496_s3 + $0x10] sm:$0xff] %v2086_v5  ;;  %v1574_v6 = vpop.f32.mrb[3].mxu0  ;;  %v2088_v0 = vpop.f32.mrb[3].mxu1 }
 0x150   :  { %2111 = vst [vmem:[%s2496_s3 + $0x8] sm:$0xff] %v1574_v6  ;;  %2113 = vst [vmem:[%s2496_s3 + $0x18] sm:$0xff] %v2088_v0 }
 0x152   :  { %v1579_v7 = vpop.f32.mrb[4].mxu0  ;;  %v2093_v8 = vpop.f32.mrb[4].mxu1 }
 0x153   :  { %v2098_v9 = vsub.f32 %v544_v63, %v1579_v7  ;;  %v2100_v10 = vsub.f32 %v1058_v1, %v2093_v8  ;;  %v1581_v11 = vpop.f32.mrb[5].mxu0  ;;  %v2095_v12 = vpop.f32.mrb[5].mxu1 }
 0x154   :  { %v2099_v13 = vsub.f32 %v546_v2, %v1581_v11  ;;  %v2101_v14 = vsub.f32 %v1060_v3, %v2095_v12 }
 0x155   :  { %2102 = vst [vmem:[%s2495_s2] sm:$0xff] %v2098_v9  ;;  %2104 = vst [vmem:[%s2495_s2 + $0x10] sm:$0xff] %v2100_v10 }
 0x156   :  { %2103 = vst [vmem:[%s2495_s2 + $0x8] sm:$0xff] %v2099_v13  ;;  %2105 = vst [vmem:[%s2495_s2 + $0x18] sm:$0xff] %v2101_v14 }
 0x157   :  { %2122 = vsyncpa [#allocation3], 1 }

</bundles_post_ra>
